<compile_context>
chip_gen: v6e
topology: v6e:2x2x1
jax: 0.10.0
libtpu: 0.0.40
codegen_flags: <defaults>
</compile_context>

<pallas_src>
import numpy as np
import jax
import jax.numpy as jnp
from jax.experimental import pallas as pl
from jax.experimental.pallas import tpu as pltpu


TIME_BLOCK = 16          # recurrence time steps handled per grid invocation
LANE = 128               # lane tile: hidden width is padded to a multiple of this
VMEM_LIMIT = 48 * 1024 * 1024  # explicit scoped-VMEM limit (safe on v5e/v6e/v7x)


def _round_up(x, m):
    return ((x + m - 1) // m) * m


# ---------------------------------------------------------------------------
# Kernel 1: tiled matmul + bias (bf16 MXU operands, f32 accumulation).
# Used for (a) the hoisted layer-0 input projection over all time steps and
# (b) the vocab projection over only the packed (valid) rows.
# ---------------------------------------------------------------------------
def _matmul_bias_kernel(x_ref, w_ref, b_ref, o_ref):
    acc = jnp.dot(x_ref[...], w_ref[...], preferred_element_type=jnp.float32)
    o_ref[...] = (acc + b_ref[...]).astype(o_ref.dtype)


def matmul_bias(x, w, b, *, out_dtype=jnp.float32):
    """(M, K) @ (K, N) + (1, N) with bf16 operands and f32 MXU accumulation.

    M and N are padded to lane-dense tile multiples (result sliced back); K is
    kept whole (fits VMEM at this model's E/H sizes).  The weight/column axis
    is the OUTER grid axis so each (K, tn) weight block is DMA'd once while the
    (smaller) x row tiles cycle on the inner axis — no re-streaming of the
    (H, V) vocab weight per row tile.
    """
    M, K = x.shape
    K2, N = w.shape
    assert K == K2 and b.shape == (1, N)

    tm = min(256, _round_up(max(M, 1), 128))     # 256 row tiles for large M
    tn = 256 if N >= 512 else 128                # 256 lane tiles for real vocabs

    Mp = _round_up(max(M, 1), tm)
    Np = _round_up(N, tn)

    x_p = jnp.pad(x.astype(jnp.bfloat16), ((0, Mp - M), (0, 0)))
    w_p = jnp.pad(w.astype(jnp.bfloat16), ((0, 0), (0, Np - N)))
    b_p = jnp.pad(b.astype(jnp.float32), ((0, 0), (0, Np - N)))

    ncol, nrow = Np // tn, Mp // tm
    out_bytes = int(Mp) * int(Np) * int(np.dtype(out_dtype).itemsize)
    cost = pl.CostEstimate(
        flops=2 * int(Mp) * int(K) * int(Np),
        transcendentals=0,
        bytes_accessed=2 * (int(Mp) * int(K) + int(K) * int(Np)) + 4 * int(Np) + out_bytes,
    )

    out = pl.pallas_call(
        _matmul_bias_kernel,
        out_shape=jax.ShapeDtypeStruct((Mp, Np), out_dtype),
        grid_spec=pltpu.PrefetchScalarGridSpec(
            num_scalar_prefetch=0,
            grid=(ncol, nrow),                                    # columns OUTER
            in_specs=[
                pl.BlockSpec((tm, K), lambda j, i: (i, 0)),       # x row tile
                pl.BlockSpec((K, tn), lambda j, i: (0, j)),       # weight col block, constant over i
                pl.BlockSpec((1, tn), lambda j, i: (0, j)),       # bias col block
            ],
            out_specs=pl.BlockSpec((tm, tn), lambda j, i: (i, j)),
        ),
        compiler_params=pltpu.CompilerParams(
            dimension_semantics=("parallel", "parallel"),         # both TCs on v7x
            vmem_limit_bytes=VMEM_LIMIT,
        ),
        cost_estimate=cost,
    )(x_p, w_p, b_p)
    return out[:M, :N]


# ---------------------------------------------------------------------------
# Kernel 2: the sequential multi-layer tanh-RNN recurrence (time-blocked,
# batch-parallel leading grid axis, value-carried hidden state).
# ---------------------------------------------------------------------------
def _recurrent_kernel(xp_ref, whh0_ref, wcat_ref, bias_ref, hid_ref, h_ref):
    """TIME_BLOCK steps of the multi-layer tanh RNN.

    xp_ref   : (TB, Bb, Hp) bf16      precomputed layer-0 input projection
    whh0_ref : (Hp, Hp) f32           layer-0 recurrent weight (pre-transposed, padded)
    wcat_ref : (max(L-1,1), 2Hp, Hp)  layers>=1 fused [W_ih; W_hh] (pre-transposed, padded)
    bias_ref : (L, 1, Hp) f32         combined b_ih + b_hh per layer (padded)
    hid_ref  : (TB, Bb, Hp) bf16      top-layer hidden states (lane-dense output block)
    h_ref    : (L, Bb, Hp) f32        hidden-state scratch, persists across time blocks
    """
    L = bias_ref.shape[0]
    TB = xp_ref.shape[0]

    @pl.when(pl.program_id(1) == 0)          # first time block of this batch block
    def _():
        h_ref[...] = jnp.zeros_like(h_ref)

    # Block entry: pull the hidden state into values (vregs); no VMEM
    # store->load of h sits on the serial dependency chain inside the block.
    hs = [h_ref[l] for l in range(L)]

    for tt in range(TB):                      # static unroll (TB known at trace time)
        # layer 0: input projection already hoisted, one recurrent matmul left
        h0 = jnp.tanh(
            xp_ref[tt].astype(jnp.float32)
            + jnp.dot(hs[0], whh0_ref[...], preferred_element_type=jnp.float32)
            + bias_ref[0]
        )
        hs[0] = h0
        x = h0
        # layers 1..L-1: one fused MXU push on [new h_{l-1}, old h_l]
        for l in range(1, L):
            xin = jnp.concatenate([x, hs[l]], axis=-1)            # (Bb, 2Hp), 128-aligned
            hl = jnp.tanh(
                jnp.dot(xin, wcat_ref[l - 1], preferred_element_type=jnp.float32)
                + bias_ref[l]
            )
            hs[l] = hl
            x = hl
        hid_ref[tt] = x.astype(hid_ref.dtype)                     # lane-dense bf16 store

    # Block exit: write the hidden state back for the next time block.
    for l in range(L):
        h_ref[l] = hs[l]


def run_recurrence(x_proj, w_hh0_t, w_cat_t, bias, *, time_block, batch_block):
    """x_proj: (Tpp, Bp, Hp) bf16 -> top-layer hidden states (Tpp, Bp, Hp) bf16."""
    Tpp, Bp, Hp = x_proj.shape
    L = bias.shape[0]
    assert Tpp % time_block == 0 and Bp % batch_block == 0 and Hp % LANE == 0

    nb, nt = Bp // batch_block, Tpp // time_block
    grid_spec = pltpu.PrefetchScalarGridSpec(
        num_scalar_prefetch=0,
        grid=(nb, nt),                                            # batch outer (parallel), time inner
        in_specs=[
            pl.BlockSpec((time_block, batch_block, Hp), lambda b, t: (t, b, 0)),
            # constant index_maps -> weights fetched once and stay VMEM-resident
            pl.BlockSpec((Hp, Hp), lambda b, t: (0, 0)),
            pl.BlockSpec(w_cat_t.shape, lambda b, t: (0, 0, 0)),
            pl.BlockSpec((L, 1, Hp), lambda b, t: (0, 0, 0)),
        ],
        out_specs=pl.BlockSpec((time_block, batch_block, Hp), lambda b, t: (t, b, 0)),
        scratch_shapes=[pltpu.VMEM((L, batch_block, Hp), jnp.float32)],
    )
    return pl.pallas_call(
        _recurrent_kernel,
        out_shape=jax.ShapeDtypeStruct((Tpp, Bp, Hp), jnp.bfloat16),
        grid_spec=grid_spec,
        compiler_params=pltpu.CompilerParams(
            # batch axis shards across v7x's 2 TensorCores; time is sequential
            dimension_semantics=("parallel", "arbitrary"),
            vmem_limit_bytes=VMEM_LIMIT,
        ),
    )(x_proj, w_hh0_t, w_cat_t, bias)


# ---------------------------------------------------------------------------
# Full forward
# ---------------------------------------------------------------------------
def decoder_rnn_forward(encoder_outputs, captions, lengths, kp, *, time_block=TIME_BLOCK):
    """DecoderRNN.forward.

    encoder_outputs: (B, E) float32
    captions:        (B, T) int32
    lengths:         python list of ints, sorted descending, each <= T+1
    kp:              kernel-prepared params (see prepare_params)
    returns:         (sum(lengths), V) vocab scores in packed order, float32.
    """
    # --- glue: embedding gather + concat of encoder feature ---
    emb = jnp.take(kp["embedding"], captions, axis=0)                        # (B, T, E)
    word_emb = jnp.concatenate(
        [encoder_outputs[:, None, :].astype(emb.dtype), emb], axis=1)        # (B, Tp, E)
    B, Tp, E = word_emb.shape
    Hp = kp["w_hh0_t"].shape[0]
    L = kp["bias"].shape[0]

    # pad batch to the sublane tile; split it across 2 cores (v7x) when large
    Bp = _round_up(max(B, 8), 8)
    if Bp >= 32:
        Bp = _round_up(Bp, 32)
        batch_block = Bp // 2        # multiple of 16: bf16-tile-safe block split
    else:
        batch_block = Bp
    Tpp = _round_up(Tp, time_block)

    x_seq = jnp.transpose(word_emb, (1, 0, 2)).astype(jnp.float32)           # (Tp, B, E)
    x_seq = jnp.pad(x_seq, ((0, Tpp - Tp), (0, Bp - B), (0, 0)))             # (Tpp, Bp, E)

    # hoisted layer-0 input projection: one big MXU matmul over all steps,
    # bf16 result -> the HBM round trip into the recurrence kernel is halved
    x_proj = matmul_bias(
        x_seq.reshape(Tpp * Bp, E), kp["w_ih0_t"],
        jnp.zeros((1, Hp), jnp.float32), out_dtype=jnp.bfloat16,
    ).reshape(Tpp, Bp, Hp)

    hidden_top = run_recurrence(
        x_proj, kp["w_hh0_t"], kp["w_cat_t"], kp["bias"],
        time_block=time_block, batch_block=batch_block)                      # (Tpp, Bp, Hp) bf16

    # --- glue: pack_padded_sequence ordering (static Python lengths) ---
    # Gather only the valid (t, b) rows of the cheap (Hp-wide) hidden states,
    # then run the expensive vocab projection over exactly those rows.
    # TODO(synk): replace this host-side gather with a scalar-prefetched row
    # gather (PrefetchScalarGridSpec + pl.Element) fused into the vocab
    # projection so a new `lengths` pattern does not retrace.
    lengths_np = np.asarray(lengths)
    flat_idx = np.array(
        [t * Bp + b for t in range(Tp) for b in range(B) if lengths_np[b] > t],
        dtype=np.int32)
    h_packed = jnp.take(hidden_top.reshape(Tpp * Bp, Hp),
                        jnp.asarray(flat_idx), axis=0)                       # (sum(lengths), Hp) bf16

    return matmul_bias(h_packed, kp["w_out_t"], kp["b_out"],
                       out_dtype=jnp.float32)                                # (sum(lengths), V)


# ---------------------------------------------------------------------------
# Params (logical, PyTorch layout) and kernel-facing preparation
# ---------------------------------------------------------------------------
def init_params(key, input_size, hidden_size, vocab_size, num_layers):
    """Deterministic parameter init (PyTorch-style uniform ranges), torch layout."""
    keys = jax.random.split(key, 3 + 4 * num_layers)
    it = iter(keys)
    s = 1.0 / np.sqrt(hidden_size)

    embedding = jax.random.normal(next(it), (vocab_size, input_size), jnp.float32)
    w_ih, w_hh, b_ih, b_hh = [], [], [], []
    for l in range(num_layers):
        in_dim = input_size if l == 0 else hidden_size
        w_ih.append(jax.random.uniform(next(it), (hidden_size, in_dim), jnp.float32, -s, s))
        w_hh.append(jax.random.uniform(next(it), (hidden_size, hidden_size), jnp.float32, -s, s))
        b_ih.append(jax.random.uniform(next(it), (hidden_size,), jnp.float32, -s, s))
        b_hh.append(jax.random.uniform(next(it), (hidden_size,), jnp.float32, -s, s))
    w_out = jax.random.uniform(next(it), (vocab_size, hidden_size), jnp.float32, -s, s)
    b_out = jax.random.uniform(next(it), (vocab_size,), jnp.float32, -s, s)
    return dict(embedding=embedding, w_ih=w_ih, w_hh=w_hh, b_ih=b_ih, b_hh=b_hh,
                w_out=w_out, b_out=b_out)


def prepare_params(p):
    """Pre-transpose, fuse and zero-pad weights so every hidden lane span is a
    128 multiple (lane-dense slices / stores inside the recurrence kernel)."""
    H = p["w_hh"][0].shape[0]
    L = len(p["w_hh"])
    Hp = _round_up(H, LANE)

    def pad_to(m, rows, cols):
        return jnp.pad(m, ((0, rows - m.shape[0]), (0, cols - m.shape[1])))

    w_ih0_t = pad_to(p["w_ih"][0].T, p["w_ih"][0].shape[1], Hp)              # (E, Hp)
    w_hh0_t = pad_to(p["w_hh"][0].T, Hp, Hp)                                 # (Hp, Hp)
    bias = jnp.stack([
        jnp.pad((p["b_ih"][l] + p["b_hh"][l])[None, :], ((0, 0), (0, Hp - H)))
        for l in range(L)])                                                  # (L, 1, Hp)
    if L > 1:
        w_cat_t = jnp.stack([
            jnp.concatenate([pad_to(p["w_ih"][l].T, Hp, Hp),
                             pad_to(p["w_hh"][l].T, Hp, Hp)], axis=0)
            for l in range(1, L)])                                           # (L-1, 2Hp, Hp)
    else:
        w_cat_t = jnp.zeros((1, 8, LANE), jnp.float32)                       # unused dummy
    w_out_t = pad_to(p["w_out"].T, Hp, p["w_out"].shape[0])                  # (Hp, V)
    return {
        "embedding": p["embedding"],
        "w_ih0_t": w_ih0_t, "w_hh0_t": w_hh0_t, "w_cat_t": w_cat_t,
        "bias": bias, "w_out_t": w_out_t, "b_out": p["b_out"][None, :],
    }


# ---------------------------------------------------------------------------
# Reference / demo
# ---------------------------------------------------------------------------
def _reference_forward(encoder_outputs, captions, lengths, p):
    """Pure-JAX reference. MXU-facing operands are rounded to bf16 at exactly
    the same places as the Pallas path so the comparison stays tight."""
    def mm_bf16(a, b):
        return jnp.dot(a.astype(jnp.bfloat16), b.astype(jnp.bfloat16),
                       preferred_element_type=jnp.float32)

    emb = jnp.take(p["embedding"], captions, axis=0)
    word_emb = jnp.concatenate([encoder_outputs[:, None, :], emb], axis=1)
    x_seq = jnp.transpose(word_emb, (1, 0, 2)).astype(jnp.float32)           # (Tp, B, E)
    Tp, B, _ = x_seq.shape
    L = len(p["w_hh"])
    H = p["w_hh"][0].shape[0]
    h = [jnp.zeros((B, H), jnp.float32) for _ in range(L)]
    rows = []
    for t in range(Tp):
        xp = mm_bf16(x_seq[t], p["w_ih"][0].T).astype(jnp.bfloat16).astype(jnp.float32)
        x = jnp.tanh(xp + h[0] @ p["w_hh"][0].T + p["b_ih"][0] + p["b_hh"][0])
        h[0] = x
        for l in range(1, L):
            x = jnp.tanh(x @ p["w_ih"][l].T + h[l] @ p["w_hh"][l].T
                         + p["b_ih"][l] + p["b_hh"][l])
            h[l] = x
        scores_t = mm_bf16(x, p["w_out"].T) + p["b_out"][None, :]
        for b in range(B):
            if lengths[b] > t:
                rows.append(scores_t[b])
    return jnp.stack(rows, axis=0)


if __name__ == "__main__":
    # small shapes consistent with the module
    B = 2      # batch
    E = 32     # input_size (embedding dim, also encoder feature dim)
    H = 32     # hidden_size
    V = 128    # vocab_size
    L = 2      # num_layers
    T = 8      # caption length (sequence length before the encoder token)

    key = jax.random.PRNGKey(0)
    k_par, k_enc, k_cap = jax.random.split(key, 3)

    params = init_params(k_par, E, H, V, L)
    kparams = prepare_params(params)
    encoder_outputs = jax.random.normal(k_enc, (B, E), jnp.float32)
    captions = jax.random.randint(k_cap, (B, T), 0, V, dtype=jnp.int32)
    lengths = [T + 1, T - 1]  # sorted descending, <= T+1 (pack_padded_sequence)

    out = decoder_rnn_forward(encoder_outputs, captions, lengths, kparams)
    out = jax.block_until_ready(out)

    ref = _reference_forward(encoder_outputs, captions, lengths, params)
    assert out.shape == (sum(lengths), V), out.shape
    err = np.max(np.abs(np.asarray(out) - np.asarray(ref)))
    assert np.allclose(np.asarray(out), np.asarray(ref), atol=2e-3, rtol=2e-3), err

    print("KERNEL_OK")
</pallas_src>

<mosaic_0001>
module attributes {stable_mosaic.version = 11 : i64} {
  func.func @_matmul_bias_kernel(%arg0: i32, %arg1: i32, %arg2: memref<128x32xbf16, #tpu.memory_space<vmem>>, %arg3: memref<32x128xbf16, #tpu.memory_space<vmem>>, %arg4: memref<1x128xf32, #tpu.memory_space<vmem>>, %arg5: memref<128x128xbf16, #tpu.memory_space<vmem>>) attributes {dimension_semantics = [#tpu.dimension_semantics<parallel>, #tpu.dimension_semantics<parallel>], iteration_bounds = array<i64: 1, 1>, scalar_prefetch = 0 : i64, scratch_operands = 0 : i64, tpu.core_type = #tpu.core_type<tc>, window_params = [{transform_indices = @transform_0, window_bounds = array<i64: 128, 32>}, {transform_indices = @transform_1, window_bounds = array<i64: 32, 128>}, {transform_indices = @transform_2, window_bounds = array<i64: 1, 128>}, {transform_indices = @transform_3, window_bounds = array<i64: 128, 128>}]} {
    %c0 = arith.constant 0 : index
    %c0_0 = arith.constant 0 : index
    %0 = vector.load %arg2[%c0, %c0_0] : memref<128x32xbf16, #tpu.memory_space<vmem>>, vector<128x32xbf16>
    %c0_1 = arith.constant 0 : index
    %c0_2 = arith.constant 0 : index
    %1 = vector.load %arg3[%c0_1, %c0_2] : memref<32x128xbf16, #tpu.memory_space<vmem>>, vector<32x128xbf16>
    %cst = arith.constant dense<0.000000e+00> : vector<128x128xf32>
    %2 = tpu.matmul %0, %1, %cst {dimension_numbers = #tpu.dot_dimension_numbers<[1], [0], [0], [1], [0, 0, 1, 1], [], []>} : vector<128x32xbf16>, vector<32x128xbf16>, vector<128x128xf32> -> vector<128x128xf32>
    %c0_3 = arith.constant 0 : index
    %c0_4 = arith.constant 0 : index
    %3 = vector.load %arg4[%c0_3, %c0_4] : memref<1x128xf32, #tpu.memory_space<vmem>>, vector<1x128xf32>
    %4 = vector.broadcast %3 : vector<1x128xf32> to vector<128x128xf32>
    %5 = arith.addf %2, %4 : vector<128x128xf32>
    %6 = arith.truncf %5 : vector<128x128xf32> to vector<128x128xbf16>
    %c0_5 = arith.constant 0 : index
    %c0_6 = arith.constant 0 : index
    %7 = vector.load %arg5[%c0_5, %c0_6] : memref<128x128xbf16, #tpu.memory_space<vmem>>, vector<128x128xbf16>
    tpu.vector_store %arg5[%c0_5, %c0_6], %6 {strides = array<i32>} : memref<128x128xbf16, #tpu.memory_space<vmem>>, vector<128x128xbf16>,
    return
  }
  func.func @transform_0(%arg0: i32, %arg1: i32) -> (i32, i32) {
    %c0_i32 = arith.constant 0 : i32
    %c0_i32_0 = arith.constant 0 : i32
    return %arg1, %c0_i32 : i32, i32
  }
  func.func @transform_1(%arg0: i32, %arg1: i32) -> (i32, i32) {
    %c0_i32 = arith.constant 0 : i32
    %c0_i32_0 = arith.constant 0 : i32
    return %c0_i32, %arg0 : i32, i32
  }
  func.func @transform_2(%arg0: i32, %arg1: i32) -> (i32, i32) {
    %c0_i32 = arith.constant 0 : i32
    %c0_i32_0 = arith.constant 0 : i32
    return %c0_i32, %arg0 : i32, i32
  }
  func.func @transform_3(%arg0: i32, %arg1: i32) -> (i32, i32) {
    %c0_i32 = arith.constant 0 : i32
    return %arg1, %arg0 : i32, i32
  }
}

</mosaic_0001>

<bundles_post_ra>
// kernel: tpu_custom_call.1
= control target key start
LH: loop header
LB: loop body
LE: loop exit
PB: predicated region body
PF: predicated region fallthrough
CT: control target
= control target key end

     0   :  { %vm95_vm0 = vcmask 261120   ;;  %s547_s0 = inlined_call_operand.vmem [shape: bf16[128,32], index: 0, kind: input, shape index: {}]   ;;  %s548_s1 = inlined_call_operand.vmem [shape: bf16[32,128], index: 1, kind: input, shape index: {}]   ;;  %s549_s2 = inlined_call_operand.vmem [shape: f32[1,128], index: 2, kind: input, shape index: {}]   ;;  %s550_s3 = inlined_call_operand.hbm [shape: bf16[128,128], index: 3, kind: output, shape index: {}]  }
   0x1   :  { %v448_v0 = vld [vmem:[%s548_s1 + $0x8] sm:$0xff]   ;;  %v449_v1 = vld [vmem:[%s548_s1] sm:$0xff]   ;;  %v454_v6 = vld [vmem:[%s547_s0 + $0x10] sm:$0xff]  }
   0x2   :  { %421 = vmatprep.subr.bf16.mxu0 %v448_v0  ;;  %441 = vmatprep.subr.bf16.mxu1 %v448_v0  ;;  %v450_v2 = vld [vmem:[%s547_s0] sm:$0xff]   ;;  %v452_v4 = vld [vmem:[%s547_s0 + $0x8] sm:$0xff]   ;;  %v455_v7 = vld [vmem:[%s547_s0 + $0x30] sm:$0xff]  }
   0x3   :  { %422 = vmatpush3.bf16.msra.mxu0 %v448_v0  ;;  %443 = vmatpush3.bf16.msra.mxu1 %v448_v0  ;;  %v451_v3 = vld [vmem:[%s547_s0 + $0x20] sm:$0xff]   ;;  %v453_v5 = vld [vmem:[%s547_s0 + $0x28] sm:$0xff]  }
   0x4   :  { %423 = vmatprep.subr.bf16.mxu0 %v449_v1  ;;  %442 = vmatprep.subr.bf16.mxu1 %v449_v1 }
   0x5   :  { %425 = vmatprep.mubr.msk.bf16.mxu0 %vm95_vm0, %v450_v2  ;;  %433 = vmatprep.mubr.msk.bf16.mxu1 %vm95_vm0, %v451_v3 }
   0x7   :  { %424 = vmatpush3.bf16.msra.mxu0 %v449_v1  ;;  %444 = vmatpush3.bf16.msra.mxu1 %v449_v1 }
   0xa   :  { %426 = vmatmul.mubr.msk.bf16.vlgmr.msra.gmra.mxu0 %vm95_vm0, %v452_v4  ;;  %434 = vmatmul.mubr.msk.bf16.vlgmr.msra.gmra.mxu1 %vm95_vm0, %v453_v5 }
   0xb   :  { %8 = vsyncpa [#allocation3], 0  ;;  %429 = vmatprep.mubr.msk.bf16.mxu0 %vm95_vm0, %v454_v6  ;;  %437 = vmatprep.mubr.msk.bf16.mxu1 %vm95_vm0, %v455_v7  ;;  %v456_v8 = vld [vmem:[%s547_s0 + $0x18] sm:$0xff]   ;;  %v313_v12 = vld [vmem:[%s549_s2] ss:$0 sm:$0xff] }
   0xc   :  { %v457_v9 = vld [vmem:[%s547_s0 + $0x38] sm:$0xff]   ;;  %s480_s0 = smov [#allocation2]  }
   0xd   :  { %s302_s2 = sshll.u32 %s480_s0, 4  ;;  %s303_s2 = int_to_ptr.vmem [resolvable:$true] %s302_s2 }
   0xe   :  { %s458_s6 = scalar_lea.vmem %s303_s2, 1024  ;;  %p463_p1 = scmp.lt.s32.totalorder %s303_s2, %s303_s2 }
   0xf   :  { %p459_p0 = scmp.ne.s32.totalorder %s303_s2, %s458_s6  ;;  %p464_p2 = scmp.lt.s32.totalorder %s458_s6, %s458_s6 }
  0x11   :  { %p465_p3 = por %p464_p2, %p463_p1 }
  0x12   :  { %430 = vmatmul.mubr.msk.bf16.gmra.mxu0 %vm95_vm0, %v456_v8  ;;  %438 = vmatmul.mubr.msk.bf16.gmra.mxu1 %vm95_vm0, %v457_v9 }
  0x13   :  { %p466_p4 = pnand %p465_p3, %p459_p0 }
  0xca   :  { %v427_v10 = vpop.f32.mrf.mxu0  ;;  %v435_v11 = vpop.f32.mrf.mxu1 }
  0xcb   :  { %v163_v17 = vadd.f32 %v427_v10, %v313_v12  ;;  %v195_v18 = vadd.f32 %v435_v11, %v313_v12 }
  0xcc   :  { %v154_v13 = vpop.f32.mrf.mxu0  ;;  %v186_v14 = vpop.f32.mrf.mxu1 }
  0xcd   :  { %v155_v21 = vadd.f32 %v313_v12, %v154_v13  ;;  %v187_v22 = vadd.f32 %v313_v12, %v186_v14 }
  0xce   :  { %v428_v15 = vpop.f32.mrf.mxu0  ;;  %v436_v16 = vpop.f32.mrf.mxu1 }
  0xcf   :  { %v166_v19 = vadd.f32 %v428_v15, %v313_v12  ;;  %v198_v20 = vadd.f32 %v436_v16, %v313_v12 }
  0xd0   :  { %v157_v23 = vpop.f32.mrf.mxu0  ;;  %v189_v24 = vpop.f32.mrf.mxu1 }
  0xd1   :  { %v372_v25 = vpack.c.bf16 %v166_v19, %v163_v17  ;;  %v392_v26 = vpack.c.bf16 %v198_v20, %v195_v18  ;;  %v158_v27 = vadd.f32 %v313_v12, %v157_v23  ;;  %v190_v28 = vadd.f32 %v313_v12, %v189_v24 }
  0xd2   :  { %v431_v29 = vpop.f32.mrf.mxu0  ;;  %v439_v30 = vpop.f32.mrf.mxu1 }
  0xd3   :  { %404 = vst [vmem:[#allocation2 + $0x8] sm:$0xff] %v372_v25   ;;  %408 = vst [vmem:[#allocation2 + $0x28] sm:$0xff] %v392_v26   ;;  %v367_v31 = vpack.c.bf16 %v158_v27, %v155_v21  ;;  %v387_v32 = vpack.c.bf16 %v190_v28, %v187_v22  ;;  %v179_v37 = vadd.f32 %v431_v29, %v313_v12 }
  0xd4   :  { %v170_v33 = vpop.f32.mrf.mxu0  ;;  %v202_v34 = vpop.f32.mrf.mxu1  ;;  %v211_v38 = vadd.f32 %v439_v30, %v313_v12 }
  0xd5   :  { %368 = vst [vmem:[#allocation2] sm:$0xff] %v367_v31   ;;  %407 = vst [vmem:[#allocation2 + $0x20] sm:$0xff] %v387_v32   ;;  %v171_v41 = vadd.f32 %v313_v12, %v170_v33  ;;  %v203_v42 = vadd.f32 %v313_v12, %v202_v34 }
  0xd6   :  { %v432_v35 = vpop.f32.mrf.mxu0  ;;  %v440_v36 = vpop.f32.mrf.mxu1 }
  0xd7   :  { %v182_v39 = vadd.f32 %v432_v35, %v313_v12  ;;  %v214_v40 = vadd.f32 %v440_v36, %v313_v12 }
  0xd8   :  { %v173_v43 = vpop.f32.mrf.mxu0  ;;  %v205_v44 = vpop.f32.mrf.mxu1 }
  0xd9   :  { %v382_v45 = vpack.c.bf16 %v182_v39, %v179_v37  ;;  %v402_v46 = vpack.c.bf16 %v214_v40, %v211_v38  ;;  %v174_v47 = vadd.f32 %v313_v12, %v173_v43  ;;  %v206_v48 = vadd.f32 %v313_v12, %v205_v44 }
  0xdb   :  { %406 = vst [vmem:[#allocation2 + $0x18] sm:$0xff] %v382_v45   ;;  %410 = vst [vmem:[#allocation2 + $0x38] sm:$0xff] %v402_v46   ;;  %v377_v49 = vpack.c.bf16 %v174_v47, %v171_v41  ;;  %v397_v50 = vpack.c.bf16 %v206_v48, %v203_v42 }
  0xdd   :  { %405 = vst [vmem:[#allocation2 + $0x10] sm:$0xff] %v377_v49   ;;  %409 = vst [vmem:[#allocation2 + $0x30] sm:$0xff] %v397_v50  }
  0xde   :  { %469 = shalt.err (!%p466_p4)
}
  0xdf   :  { %s481_s7 = smov 64   ;;  %s482_s8 = smov 4  }
  0xe0   :  { %308 = dma.vmem_to_hbm [thread:$0]  %s303_s2, 1024, %s550_s3, [#allocation3], %s481_s7, %s481_s7, %s482_s8  }
  0xe1   :  { %478 = dma.done.wait [#allocation3], 1024  }
  0xe2   :  { %479 = vsyncadd [#allocation3], 4294966272 }
  0xe3   :  { %312 = vsyncpa [#allocation3], 1 }

</bundles_post_ra>
